<compile_context>
chip_gen: v7x
topology: tpu7x:2x2x1
jax: 0.10.0
libtpu: 0.0.40
codegen_flags: <defaults>
</compile_context>

<pallas_src>
import jax
import jax.numpy as jnp
from jax.experimental import pallas as pl
from jax.experimental.pallas import tpu as pltpu

BN_EPS = 1e-5  # PyTorch BatchNorm1d default eps


def _round_up(x, m):
    return -(-x // m) * m


def _cdiv(a, b):
    return -(-a // b)


def _tpu_vmem_bytes():
    try:
        return int(pltpu.get_tpu_info().vmem_capacity_bytes)
    except Exception:
        return 64 << 20  # conservative: v7x per-TC VMEM


def _pick_row_tile(batch, n_rows, cin, cout, has_residual, out_bytes, *, max_tile=8192):
    """Large row tile (multiple of 8), sized against a generation-aware VMEM budget,
    then shrunk (if possible) so the grid has >= 4 steps for v7x megacore sharding."""
    cap = _tpu_vmem_bytes()
    budget = int(cap * 0.45)
    # double-buffered f32 input block + output block (+ residual block)
    per_row = 2 * (cin * 4 + cout * out_bytes + (cout * 4 if has_residual else 0))
    resident = 2 * cin * cout * 2 + 4 * cout * 4   # bf16 weight + bias, double-buffered
    avail = max(budget - resident, per_row * 8)
    cap_rows = max(8, min(max_tile, (avail // per_row) // 8 * 8))
    tr = min(_round_up(max(n_rows, 1), 8), cap_rows)
    while tr > 8 and batch * _cdiv(n_rows, tr) < 4:   # keep both v7x TCs busy
        tr = max(8, _round_up(tr // 2, 8))
    return tr


def _vmem_limit_bytes(tr, cin, cout, has_residual, out_bytes):
    cap = _tpu_vmem_bytes()
    need = 2 * tr * (cin * 4 + cout * out_bytes + (cout * 4 if has_residual else 0))
    need += 2 * cin * cout * 2 + 4 * cout * 4
    need += 4 << 20  # compiler scratch headroom
    return int(min(max(need, 16 << 20), cap * 5 // 8))  # <= 40 MiB on v7x, <= 80 MiB on v5e/v6e


# ---------------------------------------------------------------------------
# Pallas kernels: out = [residual +] relu(bf16(x) @ w + bias), optional lane-dense store
# ---------------------------------------------------------------------------
def _make_mm_kernel(packed_rows, has_residual):
    if has_residual:
        def kernel(x_ref, w_ref, b_ref, r_ref, o_ref):
            x = x_ref[0].astype(w_ref.dtype)              # f32 -> bf16 cast inside kernel
            y = jnp.dot(x, w_ref[...], preferred_element_type=jnp.float32)
            y = jnp.maximum(y + b_ref[0], 0.0) + r_ref[0].astype(jnp.float32)
            if packed_rows is not None:
                y = y.reshape(packed_rows, 128)           # lane-dense store layout
            o_ref[0] = y.astype(o_ref.dtype)
    else:
        def kernel(x_ref, w_ref, b_ref, o_ref):
            x = x_ref[0].astype(w_ref.dtype)
            y = jnp.dot(x, w_ref[...], preferred_element_type=jnp.float32)
            y = jnp.maximum(y + b_ref[0], 0.0)
            if packed_rows is not None:
                y = y.reshape(packed_rows, 128)
            o_ref[0] = y.astype(o_ref.dtype)
    return kernel


def _run_fused(x, wb, bias, residual, *, tr, pack, out_dtype):
    B, N, Cin = x.shape
    Cout = wb.shape[1]
    nt = _cdiv(N, tr)
    out_bytes = jnp.dtype(out_dtype).itemsize

    shared_bias = bias.shape[0] == 1
    bias_idx = (lambda b, i: (0, 0, 0)) if shared_bias else (lambda b, i: (b, 0, 0))

    in_specs = [
        pl.BlockSpec((1, tr, Cin), lambda b, i: (b, i, 0)),   # f32 activations tile
        pl.BlockSpec((Cin, Cout), lambda b, i: (0, 0)),       # resident bf16 weight
        pl.BlockSpec((1, 1, Cout), bias_idx),                 # (per-cloud) f32 bias row
    ]
    args = [x, wb, bias]
    if residual is not None:
        in_specs.append(pl.BlockSpec((1, tr, Cout), lambda b, i: (b, i, 0)))
        args.append(residual)

    if pack:
        pr = (tr * Cout) // 128
        n_pad = nt * tr
        out_shape = jax.ShapeDtypeStruct((B, n_pad * Cout // 128, 128), out_dtype)
        out_spec = pl.BlockSpec((1, pr, 128), lambda b, i: (b, i, 0))
    else:
        pr = None
        out_shape = jax.ShapeDtypeStruct((B, N, Cout), out_dtype)
        out_spec = pl.BlockSpec((1, tr, Cout), lambda b, i: (b, i, 0))

    out = pl.pallas_call(
        _make_mm_kernel(pr, residual is not None),
        out_shape=out_shape,
        grid_spec=pltpu.PrefetchScalarGridSpec(
            num_scalar_prefetch=0,
            grid=(B, nt),
            in_specs=in_specs,
            out_specs=out_spec,
        ),
        compiler_params=pltpu.CompilerParams(
            dimension_semantics=("parallel", "parallel"),
            vmem_limit_bytes=_vmem_limit_bytes(tr, Cin, Cout, residual is not None, out_bytes),
        ),
    )(*args)

    if pack:
        out = out.reshape(B, n_pad, Cout)
        if n_pad != N:
            out = out[:, :N, :]
    return out


def fused_linear_relu(x, w, bias, residual=None, *, out_dtype=jnp.float32):
    """x: (B, N, Cin) f32; w: (Cin, Cout); bias: (1 or B, 1, Cout) f32 (BN folded in);
    residual: optional (B, N, Cout) added after the ReLU.
    Returns [residual +] relu(x @ w + bias): (B, N, Cout) of out_dtype."""
    B, N, Cin = x.shape
    Cout = w.shape[1]
    x = x.astype(jnp.float32)
    wb = w.astype(jnp.bfloat16)
    bias = jnp.asarray(bias, jnp.float32)
    if residual is not None:
        residual = residual.astype(jnp.float32)

    tr = _pick_row_tile(B, N, Cin, Cout, residual is not None, jnp.dtype(out_dtype).itemsize)
    nt = _cdiv(N, tr)

    pack = (Cout < 128) and ((tr * Cout) % 128 == 0)
    if pack:
        pr = (tr * Cout) // 128
        pack = (pr % 8 == 0) or (nt == 1)   # keep packed output blocks (8,128)-aligned
    if pack:
        try:
            return _run_fused(x, wb, bias, residual, tr=tr, pack=True, out_dtype=out_dtype)
        except Exception:
            # TODO(synk): in-kernel (tr,Cout)->(pr,128) reshape failed to lower on this
            # jax/Mosaic version; fall back to natural-layout (masked) stores.
            pass
    return _run_fused(x, wb, bias, residual, tr=tr, pack=False, out_dtype=out_dtype)


# ---------------------------------------------------------------------------
# BatchNorm folding (eval-mode running stats)
# ---------------------------------------------------------------------------
def fold_bn(w, b, gamma, beta, mean, var, eps=BN_EPS):
    scale = gamma * jax.lax.rsqrt(var + eps)
    return w * scale[None, :], (b - mean) * scale + beta


# ---------------------------------------------------------------------------
# Plain-JAX glue: 3-NN interpolation (pointops.nearestneighbor + interpolation)
# ---------------------------------------------------------------------------
def three_nn_interpolate(p1, p2, feat2):
    """p1:(B,N,3) query, p2:(B,M,3) source, feat2:(B,M,C) -> (B,N,C) f32."""
    n1 = jnp.sum(p1 * p1, axis=-1)[:, :, None]
    n2 = jnp.sum(p2 * p2, axis=-1)[:, None, :]
    cross = jnp.einsum("bnd,bmd->bnm", p1, p2, precision=jax.lax.Precision.HIGHEST)
    d2 = jnp.maximum(n1 + n2 - 2.0 * cross, 0.0)
    neg_d2, idx = jax.lax.top_k(-d2, 3)
    dist = jnp.sqrt(jnp.maximum(-neg_d2, 0.0))
    dist_recip = 1.0 / (dist + 1e-8)
    norm = jnp.sum(dist_recip, axis=2, keepdims=True)
    weight = dist_recip / norm
    gathered = jnp.take_along_axis(feat2[:, None, :, :], idx[..., None], axis=2)
    return jnp.sum(weight[..., None] * gathered.astype(jnp.float32), axis=2)


# ---------------------------------------------------------------------------
# Deterministic parameter initialization
# ---------------------------------------------------------------------------
def _init_linear(key, cin, cout):
    kw, kb = jax.random.split(key)
    bound = 1.0 / (cin ** 0.5)
    w = jax.random.uniform(kw, (cin, cout), jnp.float32, -bound, bound)
    b = jax.random.uniform(kb, (cout,), jnp.float32, -bound, bound)
    return w, b


def _init_bn(key, c):
    k1, k2, k3, k4 = jax.random.split(key, 4)
    gamma = 1.0 + 0.1 * jax.random.normal(k1, (c,), jnp.float32)
    beta = 0.1 * jax.random.normal(k2, (c,), jnp.float32)
    mean = 0.05 * jax.random.normal(k3, (c,), jnp.float32)
    var = 1.0 + 0.1 * jnp.abs(jax.random.normal(k4, (c,), jnp.float32))
    return gamma, beta, mean, var


class TransitionUpPallas:
    def __init__(self, in_planes, out_planes=None, *, key, out_dtype=jnp.float32):
        self.in_planes = in_planes
        self.out_planes = out_planes
        self.out_dtype = out_dtype
        keys = jax.random.split(key, 4)
        if out_planes is None:
            c = in_planes
            # linear1: Linear(2C, C) + BN(C) + ReLU ; linear2: Linear(C, C) + ReLU
            self.w1, self.b1 = _init_linear(keys[0], 2 * c, c)
            self.bn1 = _init_bn(keys[1], c)
            self.w2, self.b2 = _init_linear(keys[2], c, c)
            self.bn2 = None
            w1f, b1f = fold_bn(self.w1, self.b1, *self.bn1)
            self.w1a, self.w1b, self.b1f = w1f[:c], w1f[c:], b1f
        else:
            # linear1: Linear(out, out) + BN(out) + ReLU ; linear2: Linear(in, out) + BN(out) + ReLU
            self.w1, self.b1 = _init_linear(keys[0], out_planes, out_planes)
            self.bn1 = _init_bn(keys[1], out_planes)
            self.w2, self.b2 = _init_linear(keys[2], in_planes, out_planes)
            self.bn2 = _init_bn(keys[3], out_planes)
            self.w1f, self.b1f = fold_bn(self.w1, self.b1, *self.bn1)
            self.w2f, self.b2f = fold_bn(self.w2, self.b2, *self.bn2)

    def __call__(self, px1, px2=None):
        p1, x1 = px1
        if px2 is None:
            # Per-cloud path (tiny, O(B*C^2)) stays in jnp; XLA fuses it.
            x_mean = jnp.mean(x1, axis=1)                            # (B, C)
            h = jnp.maximum(x_mean @ self.w2 + self.b2, 0.0)         # linear2 (no BN)
            # x_mean half of linear1 collapses into a per-cloud bias row (BN folded).
            bias = (h @ self.w1b + self.b1f)[:, None, :]             # (B, 1, C)
            # Dominant (B, N, C) pass: one kernel, no broadcast/concat materialized.
            return fused_linear_relu(x1, self.w1a, bias, out_dtype=self.out_dtype)
        p2, x2 = px2
        # linear2(x2): small intermediate, write back in bf16 to halve its HBM traffic.
        feat2 = fused_linear_relu(x2, self.w2f, self.b2f[None, None, :], out_dtype=jnp.bfloat16)
        interpolated = three_nn_interpolate(p1, p2, feat2)           # (B, N, Cout) f32
        # interp + relu(BN(x1 @ w1)) with the residual add fused into the kernel epilogue.
        return fused_linear_relu(x1, self.w1f, self.b1f[None, None, :],
                                 residual=interpolated, out_dtype=self.out_dtype)


# ---------------------------------------------------------------------------
# Pure-f32 JAX reference (mirrors the PyTorch forward literally)
# ---------------------------------------------------------------------------
def _ref_forward(mod, px1, px2=None):
    def lin_bn_relu(x, w, b, bn):
        y = x @ w + b
        if bn is not None:
            g, be, m, v = bn
            y = (y - m) * jax.lax.rsqrt(v + BN_EPS) * g + be
        return jnp.maximum(y, 0.0)

    p1, x1 = px1
    if px2 is None:
        xm = lin_bn_relu(jnp.mean(x1, axis=1, keepdims=True), mod.w2, mod.b2, mod.bn2)
        xm = jnp.broadcast_to(xm, (x1.shape[0], x1.shape[1], xm.shape[-1]))
        x = jnp.concatenate([x1, xm], axis=2)
        return lin_bn_relu(x, mod.w1, mod.b1, mod.bn1)
    p2, x2 = px2
    feat2 = lin_bn_relu(x2, mod.w2, mod.b2, mod.bn2)
    interp = three_nn_interpolate(p1, p2, feat2)
    return interp + lin_bn_relu(x1, mod.w1, mod.b1, mod.bn1)


if __name__ == "__main__":
    key = jax.random.PRNGKey(0)
    (kmod_a, kmod_b, kmod_c, kmod_d,
     kx1, kp1, kx2, kp2, kxb1, kxc, kxd) = jax.random.split(key, 11)

    # ---------- Branch A (px2 is None), small shapes ----------
    B, N, C = 2, 16, 32
    mod_a = TransitionUpPallas(C, None, key=kmod_a)
    p1 = jax.random.normal(kp1, (B, N, 3), jnp.float32)
    x1 = jax.random.normal(kx1, (B, N, C), jnp.float32)
    out_a = jax.block_until_ready(mod_a((p1, x1)))
    assert out_a.shape == (B, N, C)
    assert jnp.allclose(out_a, _ref_forward(mod_a, (p1, x1)), atol=3e-2, rtol=3e-2), "branch A mismatch"

    # ---------- Branch B (px2 given): in_planes=32, out_planes=16 ----------
    Cin, Cout, M = 32, 16, 8
    mod_b = TransitionUpPallas(Cin, Cout, key=kmod_b)
    x1b = jax.random.normal(kxb1, (B, N, Cout), jnp.float32)
    p2 = jax.random.normal(kp2, (B, M, 3), jnp.float32)
    x2 = jax.random.normal(kx2, (B, M, Cin), jnp.float32)
    out_b = jax.block_until_ready(mod_b((p1, x1b), (p2, x2)))
    assert out_b.shape == (B, N, Cout)
    assert jnp.allclose(out_b, _ref_forward(mod_b, (p1, x1b), (p2, x2)), atol=3e-2, rtol=3e-2), "branch B mismatch"

    # ---------- Branch A, larger N (exercises packed lane-dense output, multi-tile) ----------
    Nc, Cc = 2048, 64
    mod_c = TransitionUpPallas(Cc, None, key=kmod_c)
    p1c = jax.random.normal(kp1, (B, Nc, 3), jnp.float32)
    x1c = jax.random.normal(kxc, (B, Nc, Cc), jnp.float32)
    out_c = jax.block_until_ready(mod_c((p1c, x1c)))
    assert out_c.shape == (B, Nc, Cc)
    assert jnp.allclose(out_c, _ref_forward(mod_c, (p1c, x1c)), atol=3e-2, rtol=3e-2), "branch C mismatch"

    # ---------- Branch A, ragged N (exercises boundary blocks / dropped OOB stores) ----------
    Nd, Cd = 1000, 32
    mod_d = TransitionUpPallas(Cd, None, key=kmod_d)
    p1d = jax.random.normal(kp1, (B, Nd, 3), jnp.float32)
    x1d = jax.random.normal(kxd, (B, Nd, Cd), jnp.float32)
    out_d = jax.block_until_ready(mod_d((p1d, x1d)))
    assert out_d.shape == (B, Nd, Cd)
    assert jnp.allclose(out_d, _ref_forward(mod_d, (p1d, x1d)), atol=3e-2, rtol=3e-2), "branch D mismatch"

    assert all(bool(jnp.all(jnp.isfinite(o))) for o in (out_a, out_b, out_c, out_d))
    print("KERNEL_OK")
</pallas_src>

<mosaic_0001>
module attributes {stable_mosaic.version = 11 : i64} {
  func.func @kernel(%arg0: i32, %arg1: i32, %arg2: memref<1x8x32xf32, #tpu.memory_space<vmem>>, %arg3: memref<32x32xbf16, #tpu.memory_space<vmem>>, %arg4: memref<1x1x32xf32, #tpu.memory_space<vmem>>, %arg5: memref<1x8x32xf32, #tpu.memory_space<vmem>>) attributes {dimension_semantics = [#tpu.dimension_semantics<parallel>, #tpu.dimension_semantics<parallel>], iteration_bounds = array<i64: 2, 2>, scalar_prefetch = 0 : i64, scratch_operands = 0 : i64, tpu.core_type = #tpu.core_type<tc>, window_params = [{transform_indices = @transform_0, window_bounds = array<i64: 1, 8, 32>}, {pipeline_mode = #tpu.pipeline_mode<synchronous>, transform_indices = @transform_1, window_bounds = array<i64: 32, 32>}, {transform_indices = @transform_2, window_bounds = array<i64: 1, 1, 32>}, {transform_indices = @transform_3, window_bounds = array<i64: 1, 8, 32>}]} {
    %c0 = arith.constant 0 : index
    %c0_0 = arith.constant 0 : index
    %c0_1 = arith.constant 0 : index
    %0 = vector.load %arg2[%c0, %c0_0, %c0_1] : memref<1x8x32xf32, #tpu.memory_space<vmem>>, vector<1x8x32xf32>
    %1 = vector.shape_cast %0 : vector<1x8x32xf32> to vector<8x32xf32>
    %2 = arith.truncf %1 : vector<8x32xf32> to vector<8x32xbf16>
    %c0_2 = arith.constant 0 : index
    %c0_3 = arith.constant 0 : index
    %3 = vector.load %arg3[%c0_2, %c0_3] : memref<32x32xbf16, #tpu.memory_space<vmem>>, vector<32x32xbf16>
    %cst = arith.constant dense<0.000000e+00> : vector<8x32xf32>
    %4 = tpu.matmul %2, %3, %cst {dimension_numbers = #tpu.dot_dimension_numbers<[1], [0], [0], [1], [0, 0, 1, 1], [], []>} : vector<8x32xbf16>, vector<32x32xbf16>, vector<8x32xf32> -> vector<8x32xf32>
    %c0_4 = arith.constant 0 : index
    %c0_5 = arith.constant 0 : index
    %c0_6 = arith.constant 0 : index
    %5 = vector.load %arg4[%c0_4, %c0_5, %c0_6] : memref<1x1x32xf32, #tpu.memory_space<vmem>>, vector<1x1x32xf32>
    %6 = vector.shape_cast %5 : vector<1x1x32xf32> to vector<1x32xf32>
    %7 = vector.broadcast %6 : vector<1x32xf32> to vector<8x32xf32>
    %8 = arith.addf %4, %7 : vector<8x32xf32>
    %cst_7 = arith.constant 0.000000e+00 : f32
    %9 = vector.broadcast %cst_7 : f32 to vector<8x32xf32>
    %10 = arith.maximumf %8, %9 : vector<8x32xf32>
    %c0_8 = arith.constant 0 : index
    %c0_9 = arith.constant 0 : index
    %c0_10 = arith.constant 0 : index
    %11 = vector.load %arg5[%c0_8, %c0_9, %c0_10] : memref<1x8x32xf32, #tpu.memory_space<vmem>>, vector<1x8x32xf32>
    %12 = vector.shape_cast %11 : vector<1x8x32xf32> to vector<8x32xf32>
    %13 = vector.shape_cast %10 : vector<8x32xf32> to vector<1x8x32xf32>
    tpu.vector_store %arg5[%c0_8, %c0_9, %c0_10], %13 {strides = array<i32>} : memref<1x8x32xf32, #tpu.memory_space<vmem>>, vector<1x8x32xf32>,
    return
  }
  func.func @transform_0(%arg0: i32, %arg1: i32) -> (i32, i32, i32) {
    %c0_i32 = arith.constant 0 : i32
    %c0_i32_0 = arith.constant 0 : i32
    return %arg0, %arg1, %c0_i32 : i32, i32, i32
  }
  func.func @transform_1(%arg0: i32, %arg1: i32) -> (i32, i32) {
    %c0_i32 = arith.constant 0 : i32
    %c0_i32_0 = arith.constant 0 : i32
    %c0_i32_1 = arith.constant 0 : i32
    return %c0_i32, %c0_i32_0 : i32, i32
  }
  func.func @transform_2(%arg0: i32, %arg1: i32) -> (i32, i32, i32) {
    %c0_i32 = arith.constant 0 : i32
    %c0_i32_0 = arith.constant 0 : i32
    %c0_i32_1 = arith.constant 0 : i32
    return %arg0, %c0_i32, %c0_i32_0 : i32, i32, i32
  }
  func.func @transform_3(%arg0: i32, %arg1: i32) -> (i32, i32, i32) {
    %c0_i32 = arith.constant 0 : i32
    %c0_i32_0 = arith.constant 0 : i32
    return %arg0, %arg1, %c0_i32 : i32, i32, i32
  }
}

</mosaic_0001>

<bundles_post_ra>
// kernel: tpu_custom_call.1
= control target key start
LH: loop header
LB: loop body
LE: loop exit
PB: predicated region body
PF: predicated region fallthrough
CT: control target
= control target key end

     0   :  { %s986_s0 = inlined_call_operand.hbm [shape: f32[2,16,32], index: 0, kind: input, shape index: {}]   ;;  %s987_s1 = inlined_call_operand.hbm [shape: bf16[32,32], index: 1, kind: input, shape index: {}]   ;;  %s988_s2 = inlined_call_operand.vmem [shape: f32[2,1,32], index: 2, kind: input, shape index: {}]   ;;  %s989_s3 = inlined_call_operand.hbm [shape: f32[2,16,32], index: 3, kind: output, shape index: {}]  }
   0x1   :  { %997 = sst [smem:[#allocation14_spill]] %s987_s1 }
   0x2   :  { %8 = vsyncpa [#allocation3], 0 }
   0x3   :  { %10 = vsyncpa [#allocation3 + $0x1], 0 }
   0x4   :  { %11 = vsyncpa [#allocation6], 0 }
   0x5   :  { %12 = vsyncpa [#allocation4], 0 }
   0x6   :  { %14 = vsyncpa [#allocation4 + $0x1], 0  ;;  %s741_s12 = smov 0   ;;  %s743_s13 = smov 0  }
   0x7   :  { %s745_s14 = smov 0   ;;  %s747_s15 = smov 0  }
   0x8   :  { %s749_s16 = smov 0   ;;  %s751_s17 = smov 0  }
   0x9   :  { %s753_s18 = smov 0   ;;  %s755_s19 = smov 0  }
   0xa LB: > { %998 = sst [smem:[#allocation11_spill]] %s684_s12  ;;  %s425_s20 = sadd.s32 4294967295, %s712_s19   ;;  %s712_s19 = sphi %s755_s19, %s20_s19   ;;  %s708_s18 = sphi %s753_s18, %s1025_s18   ;;  %s704_s17 = sphi %s751_s17, %s1024_s17   ;;  %s700_s16 = sphi %s749_s16, %s1023_s16   ;;  %s696_s15 = sphi %s747_s15, %s1022_s15   ;;  %s692_s14 = sphi %s745_s14, %s1021_s14   ;;  %s688_s13 = sphi %s743_s13, %s1020_s13   ;;  %s684_s12 = sphi %s741_s12, %s1019_s12  }
   0xb   : > { %s426_s21 = sadd.s32 4294967294, %s712_s19   ;;  %p54_p0 = scmp.ne.s32.totalorder %s688_s13, %s684_s12 }
   0xc   : > { %p785_p1 = scmp.eq.s32.totalorder %s425_s20, 0  ;;  %p789_p2 = scmp.eq.s32.totalorder %s425_s20, 3 }
   0xd   : > { %p133_p3 = scmp.eq.s32.totalorder %s426_s21, 3  ;;  %p427_p5 = scmp.ge.s32.totalorder %s712_s19, 1 }
   0xe   : > { %s999_s22 = scalar_select %p785_p1, 1, 0 }
   0xf   : > { %s1000_s23 = scalar_select %p789_p2, 1, 0 }
  0x10   : > { %p795_p4 = por %p785_p1, %p54_p0  ;;  %p800_p6 = por %p133_p3, %p54_p0 }
  0x11   : > { %p140_p7 = scmp.lt.s32.totalorder %s712_s19, 5  ;;  %s714_s27 = smov [#allocation5]  }
  0x12   : > { %s1001_s24 = scalar_select %p795_p4, 1, 0 }
  0x13   : > { %s1002_s25 = scalar_select %p800_p6, 1, 0 }
  0x14   : > { %p805_p8 = pnand %p427_p5, %p140_p7  ;;  %s152_s28 = sshll.u32 %s714_s27, 4  ;;  %s153_s28 = int_to_ptr.vmem [resolvable:$true] %s152_s28 }
  0x15   : > { %1003 = sst [smem:[#allocation12_spill]] %s1002_s25  ;;  %s1006_s1 = sld [smem:[#allocation14_spill]] }
  0x16   : > { %s1004_s26 = scalar_select %p805_p8, 1, 0 }
  0x17   : > { %p465_p9 = pneg %p805_p8 }
  0x19   : > { %p813_p10 = pnand %p465_p9, %p785_p1 }
  0x1b   : > { %s552_s5 = scalar_lea.hbm %s1006_s1, 256  ;;  %p554_p12 = pneg %p813_p10 }
  0x1c   : > { %p553_p11 = scmp.ne.s32.totalorder %s1006_s1, %s552_s5  ;;  %p559_p3 = scmp.lt.u32.totalorder %s552_s5, %s1006_s1 }
  0x1e   : > { %p555_p13 = pnand %p554_p12, %p553_p11 }
  0x20   : > { %p556_p0 = pneg %p555_p13 }
  0x22   : > { %p561_p5 = pnand %p559_p3, %p556_p0 }
  0x24   : > { %564 = shalt.err (!%p561_p5)
}
  0x25   : > { %s565_s10 = scalar_lea.vmem %s153_s28, 256  ;;  %p573_p1 = scmp.lt.s32.totalorder %s153_s28, %s153_s28 }
  0x26   : > { %p566_p7 = scmp.ne.s32.totalorder %s153_s28, %s565_s10  ;;  %p574_p4 = scmp.lt.s32.totalorder %s565_s10, %s565_s10 }
  0x28   : > { %p568_p9 = pnand %p566_p7, %p554_p12  ;;  %p575_p8 = por %p574_p4, %p573_p1 }
  0x2a   : > { %p569_p6 = pneg %p568_p9 }
  0x2c   : > { %p576_p2 = pnand %p575_p8, %p569_p6 }
  0x2e   : > { %579 = shalt.err (!%p576_p2)
}
  0x2f   : > { %s715_s11 = smov 64   ;;  %s716_s20 = smov 4  }
  0x30   : > { %468 = dma.hbm_to_vmem [thread:$0]  (!%p813_p10), %s1006_s1, 256, %s153_s28, [#allocation6], %s715_s11, %s715_s11, %s716_s20  }
  0x31   : > { %s29_s30 = sadd.s32 1, %s704_s17  ;;  %s32_s4 = sadd.s32 1, %s708_s18 }
  0x32   : > { %p30_p1 = scmp.ge.s32.totalorder %s29_s30, 2  ;;  %s41_s5 = sadd.s32 1, %s692_s14 }
  0x33   : > { %p48_p2 = scmp.ne.s32.totalorder %s692_s14, %s688_s13  ;;  %p49_p4 = scmp.eq.s32.totalorder %s712_s19, 0 }
  0x34   : > { %s1027_s30 = smov (%p30_p1, %s29_s30), 0  ;;  %s1029_s4 = smov (!%p30_p1, %s32_s4), %s708_s18 }
  0x35   : > { %1007 = sst [smem:[#allocation13_spill]] %s1027_s30  ;;  %s37_s6 = ssub.s32 %s704_s17, %s1027_s30 }
  0x36   : > { %p34_p6 = scmp.ge.s32.totalorder %s1029_s4, 2  ;;  %p1008_p8 = scmp.ne.s32.totalorder %s1000_s23, 0 }
  0x37   : > { %p850_p10 = por %p49_p4, %p48_p2  ;;  %p478_p12 = scmp.lt.s32.totalorder %s712_s19, 4 }
  0x38   : > { %p846_p11 = por %p1008_p8, %p48_p2  ;;  %s1031_s4 = smov (%p34_p6, %s1029_s4), 0 }
  0x39   : > { %s166_s7 = sand.u32 1, %s692_s14   ;;  %s431_s8 = sshll.u32 %s708_s18, 1 }
  0x3a   : > { %s36_s9 = ssub.s32 %s708_s18, %s1031_s4  ;;  %s430_s11 = sshll.u32 %s166_s7, 3 }
  0x3b   : > { %s38_s10 = sor.u32 %s37_s6, %s36_s9  ;;  %s175_s23 = sadd.s32 %s704_s17, %s431_s8 }
  0x3c   : > { %p39_p13 = scmp.eq.s32.totalorder %s38_s10, 0  ;;  %s170_s20 = scalar_lea.vmem [#allocation2], %s430_s11 }
  0x3d   : > { %s179_s21 = sshll.u32 %s170_s20, 4  ;;  %s432_s1 = sshll.u32 %s175_s23, 7  ;;  %s865_s21 = int_to_ptr.vmem [resolvable:$true] %s179_s21 }
  0x3e   : > { %s863_s27 = scalar_select %p39_p13, %s692_s14, %s41_s5  }
  0x3f   : > { %s870_s12 = scalar_lea.hbm %s986_s0, %s432_s1  ;;  %p876_p0 = pnand %p478_p12, %p850_p10 }
  0x40   : > { %s167_s5 = scalar_lea.sflag [#allocation3], %s166_s7  ;;  %s580_s8 = scalar_lea.hbm %s870_s12, 128 }
  0x41   : > { %p581_p3 = scmp.ne.s32.totalorder %s870_s12, %s580_s8  ;;  %p582_p5 = pneg %p876_p0 }
  0x42   : > { %s585_s30 = scalar_lea.hbm %s986_s0, 512  ;;  %p586_p1 = scmp.lt.u32.totalorder %s870_s12, %s986_s0 }
  0x43   : > { %p583_p7 = pnand %p582_p5, %p581_p3  ;;  %p587_p2 = scmp.lt.u32.totalorder %s585_s30, %s580_s8 }
  0x44   : > { %p589_p6 = scmp.lt.u32.totalorder %s580_s8, %s870_s12 }
  0x45   : > { %p584_p9 = pneg %p583_p7  ;;  %p588_p4 = por %p587_p2, %p586_p1 }
  0x47   : > { %p590_p8 = por %p589_p6, %p588_p4 }
  0x49   : > { %p591_p10 = pnand %p590_p8, %p584_p9 }
  0x4b   : > { %594 = shalt.err (!%p591_p10)
}
  0x4c   : > { %s595_s7 = scalar_lea.vmem %s865_s21, 128  ;;  %s717_s10 = smov [#allocation2]  }
  0x4d   : > { %p596_p12 = scmp.ne.s32.totalorder %s865_s21, %s595_s7  ;;  %s600_s11 = sshll.u32 %s717_s10, 4  ;;  %s601_s11 = int_to_ptr.vmem [resolvable:$false] %s600_s11 }
  0x4e   : > { %s602_s23 = scalar_lea.vmem %s601_s11, 256  ;;  %p603_p7 = scmp.lt.s32.totalorder %s865_s21, %s601_s11 }
  0x4f   : > { %p598_p13 = pnand %p596_p12, %p582_p5  ;;  %p604_p1 = scmp.lt.s32.totalorder %s602_s23, %s595_s7 }
  0x51   : > { %p599_p3 = pneg %p598_p13  ;;  %p605_p2 = por %p604_p1, %p603_p7 }
  0x53   : > { %p606_p4 = pnand %p605_p2, %p599_p3 }
  0x55   : > { %609 = shalt.err (!%p606_p4)
}
  0x56   : > { %472 = dma.hbm_to_vmem [thread:$0]  (!%p876_p0), %s870_s12, 128, %s865_s21, %s167_s5  }
  0x57   : > { %p1012_p9 = scmp.ne.s32.totalorder %s1004_s26, 0 }
  0x58   : > { %s908_s20 = sand.u32 (!%p1012_p9), 1, %s688_s13   ;;  %p1013_p5 = scmp.ne.s32.totalorder (!%p1012_p9), %s1001_s24, 0 }
  0x59   : > { %194 = sbr.rel (%p1012_p9) target bundleno = 339 (0x153), region = 32  ;;  %s434_s8 = sshll.u32 (!%p1012_p9), %s908_s20, 3 }
  0x5a   : > { %s197_s1 = scalar_lea.sflag (!%p1012_p9), [#allocation3], %s908_s20  ;;  %s200_s25 = scalar_lea.vmem (!%p1012_p9), [#allocation2], %s434_s8 }
  0x60   : > { %671 = dma.done.wait (%p1013_p5), %s197_s1, 128  }
  0x61   : > { %673 = vsyncadd (%p1013_p5), %s197_s1, 4294967168  ;;  %p1014_p6 = scmp.ne.s32.totalorder %s999_s22, 0 }
  0x63   : > { %675 = dma.done.wait (%p1014_p6), [#allocation6], 256  }
  0x64   : > { %677 = vsyncadd (%p1014_p6), [#allocation6], 4294967040  ;;  %v718_v0 = vmov 0.0   ;;  %vm719_vm0 = vmmov 0   ;;  %v550_v1 = vld [vmem:[#allocation5] sm:$0xff]   ;;  %v551_v2 = vld [vmem:[#allocation5 + $0x8] sm:$0xff]  }
  0x65   : > { %449 = vmatprep.subr.bf16.mxu0 %v718_v0  ;;  %453 = vmatprep.mubr.msk.bf16.mxu0 %vm719_vm0, %v718_v0  ;;  %v234_v3 = vld [vmem:[%s200_s25] sm:$0xff]  ;;  %vm259_vm1 = vcmask 261120   ;;  %p230_p0 = scmp.lt.s32.totalorder %s700_s16, 1  ;;  %s442_s22 = sshll.u32 %s700_s16, 1 }
  0x66   : > { %450 = vmatpush3.bf16.msra.mxu0 %v550_v1  ;;  %v235_v4 = vpack.c.bf16 %v234_v3, %v234_v3  ;;  %s317_s6 = sadd.s32 %s696_s15, %s442_s22  ;;  %s229_s30 = scalar_lea.vmem [#allocation7], %s434_s8 }
  0x67   : > { %451 = vmatprep.subr.bf16.mxu0 %v718_v0  ;;  %s231_s12 = scalar_select %p230_p0, %s700_s16, 1 }
  0x68   : > { %s443_s5 = sshll.u32 %s317_s6, 7  ;;  %s321_s28 = sshll.u32 %s229_s30, 4  ;;  %s933_s28 = int_to_ptr.vmem [resolvable:$true] %s321_s28 }
  0x69   : > { %s232_s21 = scalar_lea.vmem %s988_s2, %s231_s12  ;;  %s931_s16 = scalar_lea.hbm %s989_s3, %s443_s5 }
  0x6a   : > { %452 = vmatpush3.bf16.msra.mxu0 %v551_v2  ;;  %v437_v5 = vld [vmem:[%s232_s21] ss:$0 sm:$0xff]  ;;  %s306_s15 = scalar_lea.sflag [#allocation4], %s908_s20  ;;  %s610_s10 = scalar_lea.vmem %s933_s28, 128 }
  0x6b   : > { %p611_p8 = scmp.ne.s32.totalorder %s933_s28, %s610_s10  ;;  %s720_s11 = smov [#allocation7]  }
  0x6c   : > { %s614_s23 = sshll.u32 %s720_s11, 4  ;;  %s615_s23 = int_to_ptr.vmem [resolvable:$false] %s614_s23 }
  0x6d   : > { %454 = vmatmul.mubr.msk.bf16.vlgmr.msra.gmra.mrb[0].mxu0 %vm259_vm1, %v235_v4  ;;  %p612_p10 = pnand %p611_p8, %p846_p11  ;;  %s616_s8 = scalar_lea.vmem %s615_s23, 256 }
  0x6e   : > { %p617_p13 = scmp.lt.s32.totalorder %s933_s28, %s615_s23  ;;  %p618_p3 = scmp.lt.s32.totalorder %s616_s8, %s610_s10 }
  0x6f   : > { %p613_p12 = pneg %p612_p10 }
  0x70   : > { %p619_p7 = por %p618_p3, %p617_p13 }
  0x72   : > { %p620_p1 = pnand %p619_p7, %p613_p12 }
 0x140   : > { %v297_v6 = vpop.f32.mrb[0].mxu0 }
 0x141   : > { %v298_v7 = vadd.f32 %v437_v5, %v297_v6  ;;  %v455_v8 = vpop.f32.mrb[1].mxu0 }
 0x142   : > { %v300_v9 = vpop.f32.mrb[2].mxu0 }
 0x143   : > { %v303_v10 = vmax.f32 %v298_v7, 0.0  ;;  %v456_v11 = vpop.f32.mrb[3].mxu0 }
 0x145   : > { %304 = vst.msk [vmem:[%s229_s30] sm:$0xff] %vm259_vm1, %v303_v10 }
 0x146   : > { %623 = shalt.err (!%p620_p1)
}
 0x147   : > { %s624_s20 = scalar_lea.hbm %s931_s16, 128  ;;  %s628_s12 = scalar_lea.hbm %s989_s3, 512 }
 0x148   : > { %p625_p2 = scmp.ne.s32.totalorder %s931_s16, %s624_s20  ;;  %p629_p5 = scmp.lt.u32.totalorder %s931_s16, %s989_s3 }
 0x149   : > { %p630_p6 = scmp.lt.u32.totalorder %s628_s12, %s624_s20  ;;  %p632_p8 = scmp.lt.u32.totalorder %s624_s20, %s931_s16 }
 0x14a   : > { %p626_p4 = pnand %p625_p2, %p846_p11 }
 0x14b   : > { %p631_p0 = por %p630_p6, %p629_p5 }
 0x14c   : > { %p627_p9 = pneg %p626_p4 }
 0x14d   : > { %p633_p10 = por %p632_p8, %p631_p0 }
 0x14f   : > { %p634_p12 = pnand %p633_p10, %p627_p9 }
 0x151   : > { %637 = shalt.err (!%p634_p12)
}
 0x152   : > { %463 = dma.vmem_to_hbm [thread:$0]  (%p846_p11), %s933_s28, 128, %s931_s16, %s306_s15  }
 0x153 PF: > { %s1015_s26 = sld [smem:[#allocation11_spill]]  ;;  %s1016_s21 = sld [smem:[#allocation12_spill]] }
 0x154   : > { %p480_p13 = scmp.ge.s32.totalorder %s712_s19, 2 }
 0x159   : > { %s333_s6 = sand.u32 1, %s1015_s26   ;;  %p1017_p3 = scmp.ne.s32.totalorder %s1016_s21, 0 }
 0x15a   : > { %s334_s5 = scalar_lea.sflag [#allocation4], %s333_s6 }
 0x15b   : > { %p474_p7 = pnand %p480_p13, %p1017_p3 }
 0x15d   : > { %679 = dma.done.wait (!%p474_p7), %s334_s5, 128  }
 0x15e   : > { %681 = vsyncadd (!%p474_p7), %s334_s5, 4294967168  ;;  %s20_s19 = sadd.s32 1, %s712_s19   ;;  %s1018_s29 = sld [smem:[#allocation13_spill]] }
 0x15f   : > { %p17_p1 = scmp.ge.s32.totalorder %s20_s19, 6   ;;  %s1019_s12 = smov %s688_s13 }
 0x160   : > { %s1020_s13 = smov %s692_s14  ;;  %s1021_s14 = smov %s863_s27 }
 0x161   : > { %s1022_s15 = smov %s704_s17  ;;  %s1023_s16 = smov %s708_s18 }
 0x162   : > { %s1025_s18 = smov %s1031_s4  ;;  %19 = sbr.rel (!%p17_p1) target bundleno = 10 (0xa), region = 84 }
 0x164   : > { %s1024_s17 = smov %s1018_s29 }
 0x169   :  { %339 = vsyncpa [#allocation3], 1 }
 0x16a   :  { %341 = vsyncpa [#allocation3 + $0x1], 1 }
 0x16b   :  { %342 = vsyncpa [#allocation6], 1 }
 0x16c   :  { %343 = vsyncpa [#allocation4], 1 }
 0x16d   :  { %345 = vsyncpa [#allocation4 + $0x1], 1 }

</bundles_post_ra>
